<compile_context>
chip_gen: v5e
topology: v5e:2x2
jax: 0.10.0
libtpu: 0.0.40
codegen_flags: <defaults>
</compile_context>

<pallas_src>
import jax
import jax.numpy as jnp
from jax.experimental import pallas as pl
from jax.experimental.pallas import tpu as pltpu

_BN_EPS = 1e-5


# ----------------------------------------------------------------------------
# Host-side folding / shared excitation math
# ----------------------------------------------------------------------------
def _fold_bn(w1, bn1, w2, bn2, hw):
    """Fold BN (running stats) and the 1/HW pooling factor into the 1x1 weights.

    Returns (w1f (C, Cr), b1 (1, Cr), w2f (Cr, C), b2 (1, C)), all float32.
    With these, the excitation is: hard_sigmoid(relu(sum_x @ w1f + b1) @ w2f + b2).
    """
    g1, be1, m1, v1 = (jnp.asarray(a, jnp.float32) for a in bn1)
    g2, be2, m2, v2 = (jnp.asarray(a, jnp.float32) for a in bn2)
    s1 = g1 / jnp.sqrt(v1 + _BN_EPS)
    s2 = g2 / jnp.sqrt(v2 + _BN_EPS)
    w1f = (jnp.asarray(w1, jnp.float32).T * s1[None, :]) / jnp.float32(hw)   # (C, Cr)
    w2f = jnp.asarray(w2, jnp.float32).T * s2[None, :]                        # (Cr, C)
    b1 = (be1 - m1 * s1).reshape(1, -1)                                       # (1, Cr)
    b2 = (be2 - m2 * s2).reshape(1, -1)                                       # (1, C)
    return w1f, b1, w2f, b2


def _excite(p_sum, w1f, b1, w2f, b2):
    """Excitation MLP on per-image channel *sums* (1/HW already folded into w1f)."""
    y1 = jnp.maximum(jnp.dot(p_sum, w1f, preferred_element_type=jnp.float32) + b1, 0.0)
    y2 = jnp.dot(y1, w2f, preferred_element_type=jnp.float32) + b2
    return jnp.clip((y2 + 3.0) * (1.0 / 6.0), 0.0, 1.0)      # hard-sigmoid, no divide


# ----------------------------------------------------------------------------
# Kernels
# ----------------------------------------------------------------------------
def _se_fused_kernel(x_ref, w1_ref, b1_ref, w2_ref, b2_ref, o_ref):
    """Single pass: pool + excitation MLP + reweight. x_ref/o_ref: (bt, HW, C)."""
    x = x_ref[...]                                            # I/O dtype (f32 or bf16)
    # f32 accumulation kept fused into the reduce (no standalone f32 slab copy).
    p = jnp.sum(x, axis=1, dtype=jnp.float32)                 # (bt, C)
    scale = _excite(p, w1_ref[...], b1_ref[...], w2_ref[...], b2_ref[...])   # (bt, C)
    # Multiply stays in the I/O dtype (bf16-safe, within stated tolerances);
    # use an f32 multiply here if tighter parity is ever needed.
    o_ref[...] = (x * scale.astype(x.dtype)[:, None, :]).astype(o_ref.dtype)


def _make_pool_kernel(hw, thw):
    """Two-pass phase 1: per-HW-tile partial channel sums (fully parallel grid).

    x_ref: (B, thw, C) -> psum_ref: (1, B, C) float32.  When thw does not divide
    HW the rows of the (padded) last tile are masked to zero, so any tile size
    that is a multiple of 8 is valid.
    """
    needs_mask = (hw % thw) != 0

    def kernel(x_ref, psum_ref):
        x = x_ref[...]                                        # (B, thw, C)
        if needs_mask:
            row = (jax.lax.broadcasted_iota(jnp.int32, (1, thw, 1), 1)
                   + pl.program_id(0) * thw)
            x = jnp.where(row < hw, x, jnp.zeros_like(x))
        psum_ref[...] = jnp.sum(x, axis=1, dtype=jnp.float32)[None]   # (1, B, C)

    return kernel


def _scale_kernel(x_ref, s_ref, o_ref):
    """Two-pass phase 2: out = x * scale. Pure streaming elementwise op."""
    x = x_ref[...]                                            # (1, thw, C)
    o_ref[...] = (x * s_ref[...].astype(x.dtype)).astype(o_ref.dtype)


# ----------------------------------------------------------------------------
# Device / tile-size heuristics
# ----------------------------------------------------------------------------
def _vmem_budget_bytes():
    """~3/4 of physical VMEM: ~96 MiB on v5e/v6e (128 MiB), ~48 MiB on v7x (64 MiB)."""
    cap = 64 * 1024 * 1024                                    # conservative fallback
    try:
        cap = int(pltpu.get_tpu_info().vmem_capacity_bytes)
    except Exception:
        pass
    return (cap * 3) // 4


def _padded_channels(c, mode):
    """Optionally round C up to a multiple of 128 for lane-dense stores."""
    if c % 128 == 0 or mode is False:
        return c
    cp = ((c + 127) // 128) * 128
    if mode is True:
        return cp
    # auto: only pad when the HBM-traffic overhead is modest (e.g. 96 -> 128).
    return cp if 2 * cp <= 3 * c else c


def _pick_batch_group(batch, slab_bytes, per_image_vmem, budget_bytes,
                      target_bytes=8 * 1024 * 1024):
    """Group images per grid step: multi-MiB DMAs, fits VMEM, keeps >=2 steps."""
    cap_vmem = max(1, budget_bytes // max(1, per_image_vmem))
    cap_tgt = max(1, target_bytes // max(1, slab_bytes))
    bt = max(1, min(batch, cap_vmem, cap_tgt))
    if batch >= 2:
        # Guarantee >= 2 grid steps so v7x's two TensorCores both get work and
        # the pipeline has something to overlap with (harmless on v5e/v6e).
        bt = min(bt, max(1, batch // 2))
    return bt


def _pick_hw_tile(hw, c, itemsize, batch, budget_bytes, target_bytes=8 * 1024 * 1024):
    """HW tile (multiple of 8, or the full HW) sized against target and VMEM."""
    row_b = max(1, c * itemsize)                              # bytes of one (..,1,C) row
    by_target = target_bytes // (row_b * max(1, batch))
    by_pool = budget_bytes // (3 * row_b * max(1, batch))     # (B,thw,C) dbl-buffered in
    by_scale = budget_bytes // (5 * row_b)                    # (1,thw,C) in+out dbl-buf
    max_rows = min(by_target, by_pool, by_scale)
    if hw <= 8 or max_rows >= hw:
        return hw                                             # block dim == full dim
    return max(8, (max_rows // 8) * 8)


# ----------------------------------------------------------------------------
# Wrappers
# ----------------------------------------------------------------------------
def se_att_block_nhwc(x, w1, bn1, w2, bn2, *, force_two_pass=False, hw_tile=None,
                      vmem_budget_bytes=None, pad_channels="auto"):
    """SE channel attention on channels-last input.

    x: (B, H, W, C), f32 or bf16 (dtype preserved).  w1: (Cr, C), w2: (C, Cr).
    bn = (gamma, beta, running_mean, running_var).
    """
    B, H, W, C0 = x.shape
    Cr = w1.shape[0]
    HW = H * W
    budget = int(vmem_budget_bytes) if vmem_budget_bytes is not None \
        else _vmem_budget_bytes()
    vmem_limit = int(budget)

    w1f, b1, w2f, b2 = _fold_bn(w1, bn1, w2, bn2, HW)
    x2 = x.reshape(B, HW, C0)                                 # free view reshape (NHWC)

    # Optional lane alignment (unmasked vst); no-op for already aligned / tiny C.
    C = _padded_channels(C0, pad_channels)
    if C != C0:
        pc = C - C0
        x2 = jnp.pad(x2, ((0, 0), (0, 0), (0, pc)))
        w1f = jnp.pad(w1f, ((0, pc), (0, 0)))
        w2f = jnp.pad(w2f, ((0, 0), (0, pc)))
        b2 = jnp.pad(b2, ((0, 0), (0, pc)))

    itemsize = x2.dtype.itemsize
    slab = HW * C * itemsize                                  # one image, one stream
    slab_f32 = HW * C * 4                                     # possible f32 temp (bf16 in)
    w_bytes = 4 * (C * Cr + Cr + Cr * C + C)
    per_image_vmem = 4 * slab + slab_f32                      # in+out dbl-buf + f32 temp

    def _full(shape):
        nd = len(shape)
        return pl.BlockSpec(shape, lambda *_: (0,) * nd)

    def _unpad(out):
        out = out[..., :C0] if C != C0 else out
        return out.reshape(B, H, W, C0)

    # ---------------- fused single-pass path (2x|x| HBM traffic) ----------------
    if not force_two_pass and per_image_vmem + w_bytes <= budget:
        bt = _pick_batch_group(B, slab, per_image_vmem, budget - w_bytes)
        grid_b = pl.cdiv(B, bt)                               # partial last group is fine
        out = pl.pallas_call(
            _se_fused_kernel,
            out_shape=jax.ShapeDtypeStruct((B, HW, C), x2.dtype),
            grid_spec=pltpu.PrefetchScalarGridSpec(
                num_scalar_prefetch=0,
                grid=(grid_b,),
                in_specs=[
                    pl.BlockSpec((bt, HW, C), lambda g: (g, 0, 0)),   # x batch-group
                    _full((C, Cr)),                                   # w1 (BN+1/HW folded)
                    _full((1, Cr)),                                   # b1
                    _full((Cr, C)),                                   # w2 (BN folded)
                    _full((1, C)),                                    # b2
                ],
                out_specs=pl.BlockSpec((bt, HW, C), lambda g: (g, 0, 0)),
            ),
            compiler_params=pltpu.CompilerParams(
                dimension_semantics=("parallel",),
                vmem_limit_bytes=vmem_limit,
            ),
        )(x2, w1f, b1, w2f, b2)
        return _unpad(out)

    # ---------------- two-pass streaming path (large feature maps) ----------------
    thw = hw_tile if hw_tile is not None else _pick_hw_tile(HW, C, itemsize, B, budget)
    assert thw == HW or thw % 8 == 0, "hw_tile must be a multiple of 8 (or H*W itself)"
    n_hw = pl.cdiv(HW, thw)

    # Phase 1: per-tile partial channel sums on a fully parallel 1-D grid
    # (megacore-shardable on v7x; no resident accumulator / arbitrary axis).
    partial = pl.pallas_call(
        _make_pool_kernel(HW, thw),
        out_shape=jax.ShapeDtypeStruct((n_hw, B, C), jnp.float32),
        grid_spec=pltpu.PrefetchScalarGridSpec(
            num_scalar_prefetch=0,
            grid=(n_hw,),
            in_specs=[pl.BlockSpec((B, thw, C), lambda h: (0, h, 0))],
            out_specs=pl.BlockSpec((1, B, C), lambda h: (h, 0, 0)),
        ),
        compiler_params=pltpu.CompilerParams(
            dimension_semantics=("parallel",),
            vmem_limit_bytes=vmem_limit,
        ),
    )(x2)

    # Tiny final reduce + excitation MLP in plain JAX (negligible work).
    scale = _excite(jnp.sum(partial, axis=0), w1f, b1, w2f, b2).reshape(B, 1, C)

    # Phase 2: HW-tiled reweight (both axes parallel; partial last tile's extra
    # rows are simply not written back).
    out = pl.pallas_call(
        _scale_kernel,
        out_shape=jax.ShapeDtypeStruct((B, HW, C), x2.dtype),
        grid_spec=pltpu.PrefetchScalarGridSpec(
            num_scalar_prefetch=0,
            grid=(B, n_hw),
            in_specs=[pl.BlockSpec((1, thw, C), lambda b, h: (b, h, 0)),
                      pl.BlockSpec((1, 1, C), lambda b, h: (b, 0, 0))],
            out_specs=pl.BlockSpec((1, thw, C), lambda b, h: (b, h, 0)),
        ),
        compiler_params=pltpu.CompilerParams(
            dimension_semantics=("parallel", "parallel"),
            vmem_limit_bytes=vmem_limit,
        ),
    )(x2, scale)
    return _unpad(out)


def se_att_block(x_nchw, w1, bn1, w2, bn2, **kw):
    """PyTorch-parity wrapper for NCHW input.

    The transposes here are layout plumbing for this standalone test only; a real
    NHWC model should call se_att_block_nhwc directly and skip them.
    """
    x = jnp.transpose(x_nchw, (0, 2, 3, 1))
    y = se_att_block_nhwc(x, w1, bn1, w2, bn2, **kw)
    return jnp.transpose(y, (0, 3, 1, 2))


# ----------------------------------------------------------------------------
# Reference (matches the PyTorch module, inference-mode BN)
# ----------------------------------------------------------------------------
def _reference(x, w1, bn1, w2, bn2):
    eps = _BN_EPS
    g1, be1, m1, v1 = bn1
    g2, be2, m2, v2 = bn2
    p = jnp.mean(x, axis=(2, 3))                              # (B, C)
    y1 = p @ w1.T
    y1 = (y1 - m1) / jnp.sqrt(v1 + eps) * g1 + be1
    y1 = jnp.maximum(y1, 0.0)
    y2 = y1 @ w2.T
    y2 = (y2 - m2) / jnp.sqrt(v2 + eps) * g2 + be2
    s = jnp.clip((y2 + 3.0) / 6.0, 0.0, 1.0)
    return x * s[:, :, None, None]


if __name__ == "__main__":
    B, C, H, W = 2, 8, 16, 16
    reduction = 4
    Cr = C // reduction

    key = jax.random.PRNGKey(0)
    (k_x, k_w1, k_w2, k_g1, k_b1, k_m1, k_v1,
     k_g2, k_b2, k_m2, k_v2) = jax.random.split(key, 11)

    x = jax.random.normal(k_x, (B, C, H, W), dtype=jnp.float32)
    w1 = jax.random.normal(k_w1, (Cr, C), dtype=jnp.float32) * 0.2   # conv1 1x1 weight
    w2 = jax.random.normal(k_w2, (C, Cr), dtype=jnp.float32) * 0.2   # conv2 1x1 weight
    bn1 = (
        1.0 + 0.1 * jax.random.normal(k_g1, (Cr,), dtype=jnp.float32),      # gamma
        0.1 * jax.random.normal(k_b1, (Cr,), dtype=jnp.float32),            # beta
        0.1 * jax.random.normal(k_m1, (Cr,), dtype=jnp.float32),            # running_mean
        jnp.abs(jax.random.normal(k_v1, (Cr,), dtype=jnp.float32)) + 0.5,   # running_var
    )
    bn2 = (
        1.0 + 0.1 * jax.random.normal(k_g2, (C,), dtype=jnp.float32),
        0.1 * jax.random.normal(k_b2, (C,), dtype=jnp.float32),
        0.1 * jax.random.normal(k_m2, (C,), dtype=jnp.float32),
        jnp.abs(jax.random.normal(k_v2, (C,), dtype=jnp.float32)) + 0.5,
    )

    ref = jax.block_until_ready(_reference(x, w1, bn1, w2, bn2))

    # Path 1: fused single-pass kernel, f32 I/O (>=2 grid steps for megacore).
    out = jax.block_until_ready(se_att_block(x, w1, bn1, w2, bn2))
    assert out.shape == (B, C, H, W)
    assert jnp.allclose(out, ref, atol=1e-4, rtol=1e-4), "fused path mismatch"

    # Path 2: two-pass streaming kernels (parallel partial-sum pool -> tiny MLP in
    # JAX -> scale), forced with a small HW tile so multi-tile pooling is exercised.
    out2 = jax.block_until_ready(
        se_att_block(x, w1, bn1, w2, bn2, force_two_pass=True, hw_tile=64))
    assert jnp.allclose(out2, ref, atol=1e-4, rtol=1e-4), "two-pass path mismatch"

    # Path 3: bf16 HBM I/O (production dtype; halves DMA bytes, math stays f32).
    x_bf16 = x.astype(jnp.bfloat16)
    out_bf = jax.block_until_ready(se_att_block(x_bf16, w1, bn1, w2, bn2))
    ref_bf = _reference(x_bf16.astype(jnp.float32), w1, bn1, w2, bn2)
    assert out_bf.dtype == jnp.bfloat16
    assert jnp.allclose(out_bf.astype(jnp.float32), ref_bf, atol=5e-2, rtol=5e-2), \
        "bf16 path mismatch"

    print("KERNEL_OK")
</pallas_src>

<mosaic_0001>
module attributes {stable_mosaic.version = 11 : i64} {
  func.func @_se_fused_kernel(%arg0: i32, %arg1: memref<1x256x8xf32, #tpu.memory_space<vmem>>, %arg2: memref<8x2xf32, #tpu.memory_space<vmem>>, %arg3: memref<1x2xf32, #tpu.memory_space<vmem>>, %arg4: memref<2x8xf32, #tpu.memory_space<vmem>>, %arg5: memref<1x8xf32, #tpu.memory_space<vmem>>, %arg6: memref<1x256x8xf32, #tpu.memory_space<vmem>>) attributes {dimension_semantics = [#tpu.dimension_semantics<parallel>], iteration_bounds = array<i64: 2>, scalar_prefetch = 0 : i64, scratch_operands = 0 : i64, tpu.core_type = #tpu.core_type<tc>, window_params = [{transform_indices = @transform_0, window_bounds = array<i64: 1, 256, 8>}, {pipeline_mode = #tpu.pipeline_mode<synchronous>, transform_indices = @transform_1, window_bounds = array<i64: 8, 2>}, {pipeline_mode = #tpu.pipeline_mode<synchronous>, transform_indices = @transform_2, window_bounds = array<i64: 1, 2>}, {pipeline_mode = #tpu.pipeline_mode<synchronous>, transform_indices = @transform_3, window_bounds = array<i64: 2, 8>}, {pipeline_mode = #tpu.pipeline_mode<synchronous>, transform_indices = @transform_4, window_bounds = array<i64: 1, 8>}, {transform_indices = @transform_5, window_bounds = array<i64: 1, 256, 8>}]} {
    %c0 = arith.constant 0 : index
    %c0_0 = arith.constant 0 : index
    %c0_1 = arith.constant 0 : index
    %0 = vector.load %arg1[%c0, %c0_0, %c0_1] : memref<1x256x8xf32, #tpu.memory_space<vmem>>, vector<1x256x8xf32>
    %cst = arith.constant dense<0.000000e+00> : vector<1x8xf32>
    %1 = vector.multi_reduction <add>, %0, %cst [1] : vector<1x256x8xf32> to vector<1x8xf32>
    %c0_2 = arith.constant 0 : index
    %c0_3 = arith.constant 0 : index
    %2 = vector.load %arg2[%c0_2, %c0_3] : memref<8x2xf32, #tpu.memory_space<vmem>>, vector<8x2xf32>
    %c0_4 = arith.constant 0 : index
    %c0_5 = arith.constant 0 : index
    %3 = vector.load %arg3[%c0_4, %c0_5] : memref<1x2xf32, #tpu.memory_space<vmem>>, vector<1x2xf32>
    %c0_6 = arith.constant 0 : index
    %c0_7 = arith.constant 0 : index
    %4 = vector.load %arg4[%c0_6, %c0_7] : memref<2x8xf32, #tpu.memory_space<vmem>>, vector<2x8xf32>
    %c0_8 = arith.constant 0 : index
    %c0_9 = arith.constant 0 : index
    %5 = vector.load %arg5[%c0_8, %c0_9] : memref<1x8xf32, #tpu.memory_space<vmem>>, vector<1x8xf32>
    %cst_10 = arith.constant dense<0.000000e+00> : vector<1x2xf32>
    %6 = tpu.matmul %1, %2, %cst_10 {dimension_numbers = #tpu.dot_dimension_numbers<[1], [0], [0], [1], [0, 0, 1, 1], [], []>} : vector<1x8xf32>, vector<8x2xf32>, vector<1x2xf32> -> vector<1x2xf32>
    %7 = arith.addf %6, %3 : vector<1x2xf32>
    %cst_11 = arith.constant 0.000000e+00 : f32
    %8 = vector.broadcast %cst_11 : f32 to vector<1x2xf32>
    %9 = arith.maximumf %7, %8 : vector<1x2xf32>
    %cst_12 = arith.constant dense<0.000000e+00> : vector<1x8xf32>
    %10 = tpu.matmul %9, %4, %cst_12 {dimension_numbers = #tpu.dot_dimension_numbers<[1], [0], [0], [1], [0, 0, 1, 1], [], []>} : vector<1x2xf32>, vector<2x8xf32>, vector<1x8xf32> -> vector<1x8xf32>
    %11 = arith.addf %10, %5 : vector<1x8xf32>
    %cst_13 = arith.constant 3.000000e+00 : f32
    %12 = vector.broadcast %cst_13 : f32 to vector<1x8xf32>
    %13 = arith.addf %11, %12 : vector<1x8xf32>
    %cst_14 = arith.constant 0.166666672 : f32
    %14 = vector.broadcast %cst_14 : f32 to vector<1x8xf32>
    %15 = arith.mulf %13, %14 : vector<1x8xf32>
    %cst_15 = arith.constant 0.000000e+00 : f32
    %cst_16 = arith.constant 1.000000e+00 : f32
    %16 = vector.broadcast %cst_15 : f32 to vector<1x8xf32>
    %17 = arith.maximumf %16, %15 : vector<1x8xf32>
    %18 = vector.broadcast %cst_16 : f32 to vector<1x8xf32>
    %19 = arith.minimumf %18, %17 : vector<1x8xf32>
    %20 = vector.shape_cast %19 : vector<1x8xf32> to vector<1x1x8xf32>
    %21 = vector.broadcast %20 : vector<1x1x8xf32> to vector<1x256x8xf32>
    %22 = arith.mulf %0, %21 : vector<1x256x8xf32>
    %c0_17 = arith.constant 0 : index
    %c0_18 = arith.constant 0 : index
    %c0_19 = arith.constant 0 : index
    %23 = vector.load %arg6[%c0_17, %c0_18, %c0_19] : memref<1x256x8xf32, #tpu.memory_space<vmem>>, vector<1x256x8xf32>
    tpu.vector_store %arg6[%c0_17, %c0_18, %c0_19], %22 {strides = array<i32>} : memref<1x256x8xf32, #tpu.memory_space<vmem>>, vector<1x256x8xf32>,
    return
  }
  func.func @transform_0(%arg0: i32) -> (i32, i32, i32) {
    %c0_i32 = arith.constant 0 : i32
    %c0_i32_0 = arith.constant 0 : i32
    %c0_i32_1 = arith.constant 0 : i32
    return %arg0, %c0_i32, %c0_i32_0 : i32, i32, i32
  }
  func.func @transform_1(%arg0: i32) -> (i32, i32) {
    %c0_i32 = arith.constant 0 : i32
    %c0_i32_0 = arith.constant 0 : i32
    %c0_i32_1 = arith.constant 0 : i32
    return %c0_i32, %c0_i32_0 : i32, i32
  }
  func.func @transform_2(%arg0: i32) -> (i32, i32) {
    %c0_i32 = arith.constant 0 : i32
    %c0_i32_0 = arith.constant 0 : i32
    %c0_i32_1 = arith.constant 0 : i32
    return %c0_i32, %c0_i32_0 : i32, i32
  }
  func.func @transform_3(%arg0: i32) -> (i32, i32) {
    %c0_i32 = arith.constant 0 : i32
    %c0_i32_0 = arith.constant 0 : i32
    %c0_i32_1 = arith.constant 0 : i32
    return %c0_i32, %c0_i32_0 : i32, i32
  }
  func.func @transform_4(%arg0: i32) -> (i32, i32) {
    %c0_i32 = arith.constant 0 : i32
    %c0_i32_0 = arith.constant 0 : i32
    %c0_i32_1 = arith.constant 0 : i32
    return %c0_i32, %c0_i32_0 : i32, i32
  }
  func.func @transform_5(%arg0: i32) -> (i32, i32, i32) {
    %c0_i32 = arith.constant 0 : i32
    %c0_i32_0 = arith.constant 0 : i32
    %c0_i32_1 = arith.constant 0 : i32
    return %arg0, %c0_i32, %c0_i32_0 : i32, i32, i32
  }
}

</mosaic_0001>

<bundles_post_ra>
// kernel: tpu_custom_call.1
= control target key start
LH: loop header
LB: loop body
LE: loop exit
PB: predicated region body
PF: predicated region fallthrough
CT: control target
= control target key end

     0   :  { %s569_s18 = smov 0   ;;  %s866_s0 = inlined_call_operand.vmem [shape: f32[2,256,8], index: 0, kind: input, shape index: {}]   ;;  %s867_s1 = inlined_call_operand.vmem [shape: f32[8,2], index: 1, kind: input, shape index: {}]   ;;  %s868_s2 = inlined_call_operand.vmem [shape: f32[1,2], index: 2, kind: input, shape index: {}]   ;;  %s869_s3 = inlined_call_operand.vmem [shape: f32[2,8], index: 3, kind: input, shape index: {}]   ;;  %s870_s4 = inlined_call_operand.vmem [shape: f32[1,8], index: 4, kind: input, shape index: {}]   ;;  %s871_s5 = inlined_call_operand.vmem [shape: f32[2,256,8], index: 5, kind: output, shape index: {}]  }
   0x1 LB: > { %s507_s19 = sadd.s32 4294967295, %s537_s18   ;;  %p511_p0 = scmp.ge.s32.totalorder %s537_s18, 1  ;;  %s537_s18 = sphi %s569_s18, %s15_s18  }
   0x2   : > { %p187_p1 = scmp.lt.s32.totalorder %s537_s18, 3 }
   0x4   : > { %p188_p2 = pnand %p511_p0, %p187_p1 }
   0x5   : > { %p215_p3 = scmp.lt.s32.totalorder (!%p188_p2), %s507_s19, 1 }
   0x6   : > { %191 = sbr.rel (%p188_p2) target bundleno = 392 (0x188), region = 40 }
   0xb   : > { %v327_v0 = vld [vmem:[%s867_s1] sm:$0xff]  ;;  %s873_s19 = smov (!%p215_p3, %s507_s19), 1  ;;  %vm257_vm0 = vcmask 64512   ;;  %vm359_vm1 = vcmask 1041408   ;;  %vm355_vm2 = vcmask 15360  }
   0xc   : > { %349 = vmatpush.msra.mxu0 %v327_v0  ;;  %s521_s22 = sshll.u32 %s873_s19, 8 }
   0xd   : > { %s588_s25 = scalar_lea.vmem %s866_s0, %s521_s22  ;;  %s765_s9 = scalar_lea.vmem %s871_s5, %s521_s22 }
   0xe   : > { %v591_v1 = vld [vmem:[%s588_s25] sm:$0xff]  ;;  %v594_v2 = vld [vmem:[%s588_s25 + $0x8] sm:$0xff]  ;;  %v597_v3 = vld [vmem:[%s588_s25 + $0x10] sm:$0xff] }
   0xf   : > { %v600_v4 = vld [vmem:[%s588_s25 + $0x18] sm:$0xff]  ;;  %v258_v5 = vsel %vm257_vm0, %v591_v1, 0.0  ;;  %v259_v6 = vsel %vm257_vm0, %v594_v2, 0.0  ;;  %v261_v7 = vsel %vm257_vm0, %v597_v3, 0.0  ;;  %v609_v8 = vld [vmem:[%s588_s25 + $0x20] sm:$0xff]  ;;  %v614_v11 = vld [vmem:[%s588_s25 + $0x28] sm:$0xff] }
  0x10   : > { %v260_v9 = vadd.f32 %v259_v6, %v258_v5  ;;  %v263_v10 = vsel %vm257_vm0, %v600_v4, 0.0  ;;  %v265_v13 = vsel %vm257_vm0, %v609_v8, 0.0  ;;  %v619_v14 = vld [vmem:[%s588_s25 + $0x30] sm:$0xff]  ;;  %v267_v16 = vsel %vm257_vm0, %v614_v11, 0.0  ;;  %v624_v17 = vld [vmem:[%s588_s25 + $0x38] sm:$0xff]  ;;  %v629_v20 = vld [vmem:[%s588_s25 + $0x40] sm:$0xff] }
  0x11   : > { %v269_v19 = vsel %vm257_vm0, %v619_v14, 0.0  ;;  %v271_v22 = vsel %vm257_vm0, %v624_v17, 0.0  ;;  %v634_v23 = vld [vmem:[%s588_s25 + $0x48] sm:$0xff]  ;;  %v273_v25 = vsel %vm257_vm0, %v629_v20, 0.0  ;;  %v639_v26 = vld [vmem:[%s588_s25 + $0x50] sm:$0xff]  ;;  %v644_v29 = vld [vmem:[%s588_s25 + $0x58] sm:$0xff] }
  0x12   : > { %v262_v12 = vadd.f32 %v261_v7, %v260_v9  ;;  %v275_v28 = vsel %vm257_vm0, %v634_v23, 0.0  ;;  %v277_v31 = vsel %vm257_vm0, %v639_v26, 0.0  ;;  %v649_v32 = vld [vmem:[%s588_s25 + $0x60] sm:$0xff]  ;;  %v279_v34 = vsel %vm257_vm0, %v644_v29, 0.0  ;;  %v654_v35 = vld [vmem:[%s588_s25 + $0x68] sm:$0xff]  ;;  %v659_v38 = vld [vmem:[%s588_s25 + $0x70] sm:$0xff] }
  0x13   : > { %v281_v37 = vsel %vm257_vm0, %v649_v32, 0.0  ;;  %v283_v40 = vsel %vm257_vm0, %v654_v35, 0.0  ;;  %v664_v41 = vld [vmem:[%s588_s25 + $0x78] sm:$0xff]  ;;  %v285_v43 = vsel %vm257_vm0, %v659_v38, 0.0  ;;  %v669_v44 = vld [vmem:[%s588_s25 + $0x80] sm:$0xff]  ;;  %v674_v47 = vld [vmem:[%s588_s25 + $0x88] sm:$0xff] }
  0x14   : > { %v264_v15 = vadd.f32 %v263_v10, %v262_v12  ;;  %v287_v46 = vsel %vm257_vm0, %v664_v41, 0.0  ;;  %v289_v49 = vsel %vm257_vm0, %v669_v44, 0.0  ;;  %v679_v50 = vld [vmem:[%s588_s25 + $0x90] sm:$0xff]  ;;  %v291_v52 = vsel %vm257_vm0, %v674_v47, 0.0  ;;  %v684_v53 = vld [vmem:[%s588_s25 + $0x98] sm:$0xff]  ;;  %v689_v56 = vld [vmem:[%s588_s25 + $0xa0] sm:$0xff] }
  0x15   : > { %v293_v55 = vsel %vm257_vm0, %v679_v50, 0.0  ;;  %v295_v58 = vsel %vm257_vm0, %v684_v53, 0.0  ;;  %v694_v59 = vld [vmem:[%s588_s25 + $0xa8] sm:$0xff]  ;;  %v297_v61 = vsel %vm257_vm0, %v689_v56, 0.0  ;;  %v699_v62 = vld [vmem:[%s588_s25 + $0xb0] sm:$0xff]  ;;  %v704_v5 = vld [vmem:[%s588_s25 + $0xb8] sm:$0xff] }
  0x16   : > { %v266_v18 = vadd.f32 %v265_v13, %v264_v15  ;;  %v299_v0 = vsel %vm257_vm0, %v694_v59, 0.0  ;;  %v301_v7 = vsel %vm257_vm0, %v699_v62, 0.0  ;;  %v709_v9 = vld [vmem:[%s588_s25 + $0xc0] sm:$0xff]  ;;  %v303_v12 = vsel %vm257_vm0, %v704_v5, 0.0  ;;  %v714_v13 = vld [vmem:[%s588_s25 + $0xc8] sm:$0xff] }
  0x18   : > { %v268_v21 = vadd.f32 %v267_v16, %v266_v18  ;;  %v305_v16 = vsel %vm257_vm0, %v709_v9, 0.0  ;;  %v719_v18 = vld [vmem:[%s588_s25 + $0xd0] sm:$0xff] }
  0x1a   : > { %v270_v24 = vadd.f32 %v269_v19, %v268_v21  ;;  %v307_v21 = vsel %vm257_vm0, %v714_v13, 0.0 }
  0x1c   : > { %v272_v27 = vadd.f32 %v271_v22, %v270_v24  ;;  %v724_v22 = vld [vmem:[%s588_s25 + $0xd8] sm:$0xff] }
  0x1e   : > { %v274_v30 = vadd.f32 %v273_v25, %v272_v27  ;;  %v309_v25 = vsel %vm257_vm0, %v719_v18, 0.0  ;;  %v729_v27 = vld [vmem:[%s588_s25 + $0xe0] sm:$0xff] }
  0x20   : > { %v276_v33 = vadd.f32 %v275_v28, %v274_v30  ;;  %v311_v30 = vsel %vm257_vm0, %v724_v22, 0.0 }
  0x22   : > { %v278_v36 = vadd.f32 %v277_v31, %v276_v33  ;;  %v734_v31 = vld [vmem:[%s588_s25 + $0xe8] sm:$0xff] }
  0x24   : > { %v280_v39 = vadd.f32 %v279_v34, %v278_v36  ;;  %v313_v34 = vsel %vm257_vm0, %v729_v27, 0.0  ;;  %v739_v36 = vld [vmem:[%s588_s25 + $0xf0] sm:$0xff] }
  0x26   : > { %v282_v42 = vadd.f32 %v281_v37, %v280_v39  ;;  %v315_v39 = vsel %vm257_vm0, %v734_v31, 0.0 }
  0x28   : > { %v284_v45 = vadd.f32 %v283_v40, %v282_v42  ;;  %v744_v40 = vld [vmem:[%s588_s25 + $0xf8] sm:$0xff] }
  0x2a   : > { %v286_v48 = vadd.f32 %v285_v43, %v284_v45  ;;  %v317_v43 = vsel %vm257_vm0, %v739_v36, 0.0 }
  0x2c   : > { %v288_v51 = vadd.f32 %v287_v46, %v286_v48  ;;  %v319_v46 = vsel %vm257_vm0, %v744_v40, 0.0 }
  0x2e   : > { %v290_v54 = vadd.f32 %v289_v49, %v288_v51 }
  0x30   : > { %v292_v57 = vadd.f32 %v291_v52, %v290_v54 }
  0x32   : > { %v294_v60 = vadd.f32 %v293_v55, %v292_v57 }
  0x34   : > { %v296_v63 = vadd.f32 %v295_v58, %v294_v60  ;;  %v329_v60 = vld [vmem:[%s869_s3] sm:$0x3] }
  0x35   : > { %517 = vmatpush.msk.msra.mxu1 %vm359_vm1, %v329_v60 }
  0x36   : > { %v298_v6 = vadd.f32 %v297_v61, %v296_v63  ;;  %v328_v61 = vld [vmem:[%s868_s2] sm:$0x1] }
  0x38   : > { %v300_v10 = vadd.f32 %v299_v0, %v298_v6 }
  0x3a   : > { %v302_v15 = vadd.f32 %v301_v7, %v300_v10  ;;  %v330_v7 = vld [vmem:[%s870_s4] sm:$0x1] }
  0x3c   : > { %v304_v19 = vadd.f32 %v303_v12, %v302_v15 }
  0x3e   : > { %v306_v24 = vadd.f32 %v305_v16, %v304_v19 }
  0x40   : > { %v308_v28 = vadd.f32 %v307_v21, %v306_v24 }
  0x42   : > { %v310_v33 = vadd.f32 %v309_v25, %v308_v28 }
  0x44   : > { %v312_v37 = vadd.f32 %v311_v30, %v310_v33 }
  0x46   : > { %v314_v42 = vadd.f32 %v313_v34, %v312_v37 }
  0x48   : > { %v316_v45 = vadd.f32 %v315_v39, %v314_v42 }
  0x4a   : > { %v318_v48 = vadd.f32 %v317_v43, %v316_v45 }
  0x4c   : > { %v320_v49 = vadd.f32 %v319_v46, %v318_v48 }
  0x4e   : > { %v321_v51 = vrot.slane %v320_v49, 4 }
  0x50   : > { %v322_v52 = vadd.f32 %v321_v51, %v320_v49 }
  0x52   : > { %v323_v54 = vrot.slane %v322_v52, 2 }
  0x54   : > { %v324_v55 = vadd.f32 %v323_v54, %v322_v52 }
  0x56   : > { %v325_v57 = vrot.slane %v324_v55, 1 }
  0x58   : > { %v326_v58 = vadd.f32 %v325_v57, %v324_v55 }
  0x5a   : > { %516 = vmatmul.msk.f32.vlgmr.msra.gmra.mxu0 %vm257_vm0, %v326_v58 }
  0xd7   : > { %v351_v63 = vpop.f32.mrf.mxu0 }
  0xd8   : > { %v352_v0 = vadd.f32 %v351_v63, %v328_v61 }
  0xda   : > { %v354_v6 = vmax.f32 %v352_v0, 0.0 }
  0xdc   : > { %518 = vmatmul.msk.f32.vlgmr.msra.gmra.mxu1 %vm355_vm2, %v354_v6 }
 0x159   : > { %v380_v10 = vpop.f32.mrf.mxu1 }
 0x15a   : > { %v381_v12 = vadd.f32 %v380_v10, %v330_v7 }
 0x15c   : > { %v383_v15 = vadd.f32 3.0, %v381_v12 }
 0x15e   : > { %v384_v16 = vmul.f32 0.16666667, %v383_v15 }
 0x160   : > { %v385_v19 = vmax.f32 %v384_v16, 0.0 }
 0x162   : > { %v386_v21 = vmin.f32 %v385_v19, 1.0 }
 0x164   : > { %v387_v24 = vperm.slane %v386_v21, 0 }
 0x166   : > { %v388_v25 = vmul.f32 %v387_v24, %v591_v1  ;;  %v389_v28 = vmul.f32 %v387_v24, %v594_v2  ;;  %v390_v30 = vmul.f32 %v387_v24, %v597_v3  ;;  %v391_v33 = vmul.f32 %v387_v24, %v600_v4 }
 0x167   : > { %v392_v34 = vmul.f32 %v387_v24, %v609_v8  ;;  %v393_v37 = vmul.f32 %v387_v24, %v614_v11  ;;  %v394_v1 = vmul.f32 %v387_v24, %v619_v14  ;;  %v395_v2 = vmul.f32 %v387_v24, %v624_v17 }
 0x168   : > { %420 = vst.msk [vmem:[%s765_s9] sm:$0xff] %vm257_vm0, %v388_v25  ;;  %v396_v3 = vmul.f32 %v387_v24, %v629_v20  ;;  %v397_v4 = vmul.f32 %v387_v24, %v634_v23  ;;  %v398_v8 = vmul.f32 %v387_v24, %v639_v26  ;;  %v399_v11 = vmul.f32 %v387_v24, %v644_v29 }
 0x169   : > { %421 = vst.msk [vmem:[%s765_s9 + $0x8] sm:$0xff] %vm257_vm0, %v389_v28  ;;  %v400_v14 = vmul.f32 %v387_v24, %v649_v32  ;;  %v401_v17 = vmul.f32 %v387_v24, %v654_v35  ;;  %v402_v20 = vmul.f32 %v387_v24, %v659_v38  ;;  %v403_v23 = vmul.f32 %v387_v24, %v664_v41 }
 0x16a   : > { %422 = vst.msk [vmem:[%s765_s9 + $0x10] sm:$0xff] %vm257_vm0, %v390_v30  ;;  %v404_v26 = vmul.f32 %v387_v24, %v669_v44  ;;  %v405_v29 = vmul.f32 %v387_v24, %v674_v47  ;;  %v406_v32 = vmul.f32 %v387_v24, %v679_v50  ;;  %v407_v35 = vmul.f32 %v387_v24, %v684_v53 }
 0x16b   : > { %423 = vst.msk [vmem:[%s765_s9 + $0x18] sm:$0xff] %vm257_vm0, %v391_v33  ;;  %v408_v38 = vmul.f32 %v387_v24, %v689_v56  ;;  %v409_v41 = vmul.f32 %v387_v24, %v694_v59  ;;  %v410_v44 = vmul.f32 %v387_v24, %v699_v62  ;;  %v411_v47 = vmul.f32 %v387_v24, %v704_v5 }
 0x16c   : > { %424 = vst.msk [vmem:[%s765_s9 + $0x20] sm:$0xff] %vm257_vm0, %v392_v34  ;;  %v412_v50 = vmul.f32 %v387_v24, %v709_v9  ;;  %v413_v53 = vmul.f32 %v387_v24, %v714_v13  ;;  %v414_v56 = vmul.f32 %v387_v24, %v719_v18  ;;  %v415_v59 = vmul.f32 %v387_v24, %v724_v22 }
 0x16d   : > { %425 = vst.msk [vmem:[%s765_s9 + $0x28] sm:$0xff] %vm257_vm0, %v393_v37  ;;  %v416_v62 = vmul.f32 %v387_v24, %v729_v27  ;;  %v417_v5 = vmul.f32 %v387_v24, %v734_v31  ;;  %v418_v9 = vmul.f32 %v387_v24, %v739_v36  ;;  %v419_v13 = vmul.f32 %v387_v24, %v744_v40 }
 0x16e   : > { %426 = vst.msk [vmem:[%s765_s9 + $0x30] sm:$0xff] %vm257_vm0, %v394_v1 }
 0x16f   : > { %427 = vst.msk [vmem:[%s765_s9 + $0x38] sm:$0xff] %vm257_vm0, %v395_v2 }
 0x170   : > { %428 = vst.msk [vmem:[%s765_s9 + $0x40] sm:$0xff] %vm257_vm0, %v396_v3 }
 0x171   : > { %429 = vst.msk [vmem:[%s765_s9 + $0x48] sm:$0xff] %vm257_vm0, %v397_v4 }
 0x172   : > { %430 = vst.msk [vmem:[%s765_s9 + $0x50] sm:$0xff] %vm257_vm0, %v398_v8 }
 0x173   : > { %431 = vst.msk [vmem:[%s765_s9 + $0x58] sm:$0xff] %vm257_vm0, %v399_v11 }
 0x174   : > { %432 = vst.msk [vmem:[%s765_s9 + $0x60] sm:$0xff] %vm257_vm0, %v400_v14 }
 0x175   : > { %433 = vst.msk [vmem:[%s765_s9 + $0x68] sm:$0xff] %vm257_vm0, %v401_v17 }
 0x176   : > { %434 = vst.msk [vmem:[%s765_s9 + $0x70] sm:$0xff] %vm257_vm0, %v402_v20 }
 0x177   : > { %435 = vst.msk [vmem:[%s765_s9 + $0x78] sm:$0xff] %vm257_vm0, %v403_v23 }
 0x178   : > { %436 = vst.msk [vmem:[%s765_s9 + $0x80] sm:$0xff] %vm257_vm0, %v404_v26 }
 0x179   : > { %437 = vst.msk [vmem:[%s765_s9 + $0x88] sm:$0xff] %vm257_vm0, %v405_v29 }
 0x17a   : > { %438 = vst.msk [vmem:[%s765_s9 + $0x90] sm:$0xff] %vm257_vm0, %v406_v32 }
 0x17b   : > { %439 = vst.msk [vmem:[%s765_s9 + $0x98] sm:$0xff] %vm257_vm0, %v407_v35 }
 0x17c   : > { %440 = vst.msk [vmem:[%s765_s9 + $0xa0] sm:$0xff] %vm257_vm0, %v408_v38 }
 0x17d   : > { %441 = vst.msk [vmem:[%s765_s9 + $0xa8] sm:$0xff] %vm257_vm0, %v409_v41 }
 0x17e   : > { %442 = vst.msk [vmem:[%s765_s9 + $0xb0] sm:$0xff] %vm257_vm0, %v410_v44 }
 0x17f   : > { %443 = vst.msk [vmem:[%s765_s9 + $0xb8] sm:$0xff] %vm257_vm0, %v411_v47 }
 0x180   : > { %444 = vst.msk [vmem:[%s765_s9 + $0xc0] sm:$0xff] %vm257_vm0, %v412_v50 }
 0x181   : > { %445 = vst.msk [vmem:[%s765_s9 + $0xc8] sm:$0xff] %vm257_vm0, %v413_v53 }
 0x182   : > { %446 = vst.msk [vmem:[%s765_s9 + $0xd0] sm:$0xff] %vm257_vm0, %v414_v56 }
 0x183   : > { %447 = vst.msk [vmem:[%s765_s9 + $0xd8] sm:$0xff] %vm257_vm0, %v415_v59 }
 0x184   : > { %448 = vst.msk [vmem:[%s765_s9 + $0xe0] sm:$0xff] %vm257_vm0, %v416_v62 }
 0x185   : > { %449 = vst.msk [vmem:[%s765_s9 + $0xe8] sm:$0xff] %vm257_vm0, %v417_v5 }
 0x186   : > { %450 = vst.msk [vmem:[%s765_s9 + $0xf0] sm:$0xff] %vm257_vm0, %v418_v9 }
 0x187   : > { %451 = vst.msk [vmem:[%s765_s9 + $0xf8] sm:$0xff] %vm257_vm0, %v419_v13 }
 0x188 PF: > { %s15_s18 = sadd.s32 1, %s537_s18  }
 0x189   : > { %p12_p4 = scmp.ge.s32.totalorder %s15_s18, 4  }
 0x18b   :  { %14 = sbr.rel (!%p12_p4) target bundleno = 1 (0x1), region = 70 }

</bundles_post_ra>
